<compile_context>
chip_gen: v7x
topology: tpu7x:2x2x1
jax: 0.10.0
libtpu: 0.0.40
codegen_flags: <defaults>
</compile_context>

<pallas_src>
import math
import jax
import jax.numpy as jnp
from jax.experimental import pallas as pl
from jax.experimental.pallas import tpu as pltpu

C = jnp.complex64

# ----------------------------------------------------------------------------
# Circuit construction (parameter / unitary setup — plain JAX "glue")
# ----------------------------------------------------------------------------
I2 = jnp.eye(2, dtype=C)
X2 = jnp.array([[0, 1], [1, 0]], dtype=C)
P0 = jnp.array([[1, 0], [0, 0]], dtype=C)
P1 = jnp.array([[0, 0], [0, 1]], dtype=C)


def kron_list(mats):
    out = mats[0]
    for m in mats[1:]:
        out = jnp.kron(out, m)
    return out


def ry(theta):
    c = jnp.cos(theta / 2.0)
    s = jnp.sin(theta / 2.0)
    return jnp.array([[c, -s], [s, c]], dtype=C)


def rz(theta):
    return jnp.array([[jnp.exp(-0.5j * theta), 0.0],
                      [0.0, jnp.exp(0.5j * theta)]], dtype=C)


def ry_layer(n, thetas):
    return kron_list([ry(thetas[i]) for i in range(n)])


def rz_layer(n, thetas):
    return kron_list([rz(thetas[i]) for i in range(n)])


def yzy_layer(n, params):
    # params length 3n: RY(params[0:n]) -> RZ(params[n:2n]) -> RY(params[2n:3n])
    return ry_layer(n, params[2 * n:3 * n]) @ rz_layer(n, params[n:2 * n]) @ ry_layer(n, params[0:n])


def cnot(n, control, target):
    a = [I2] * n
    a[control] = P0
    b = [I2] * n
    b[control] = P1
    b[target] = X2
    return kron_list(a) + kron_list(b)


def ring_of_cnot(n):
    U = jnp.eye(2 ** n, dtype=C)
    for i in range(n):
        U = cnot(n, i, (i + 1) % n) @ U
    return U


def ring_of_cnot2(n):
    U = jnp.eye(2 ** n, dtype=C)
    for i in range(n):
        U = cnot(n, i, (i + 2) % n) @ U
    return U


def basic_entangle_layer(n, params):
    # params length 3n: 3 repetitions of [single-qubit rotation layer + ring_of_cnot]
    # TODO(synk): deepquantum's BasicEntangleLayer rotation axis assumed RY here.
    U = jnp.eye(2 ** n, dtype=C)
    for r in range(3):
        U = ring_of_cnot(n) @ ry_layer(n, params[r * n:(r + 1) * n]) @ U
    return U


def build_unitary(n, weight):
    U = jnp.eye(2 ** n, dtype=C)
    U = yzy_layer(n, weight[0:3 * n]) @ U
    U = ring_of_cnot(n) @ U
    U = yzy_layer(n, weight[3 * n:6 * n]) @ U
    U = ring_of_cnot(n) @ U
    U = yzy_layer(n, weight[6 * n:9 * n]) @ U
    U = ring_of_cnot2(n) @ U
    U = yzy_layer(n, weight[9 * n:12 * n]) @ U
    U = ring_of_cnot2(n) @ U
    U = basic_entangle_layer(n, weight[12 * n:15 * n]) @ U
    U = yzy_layer(n, weight[15 * n:18 * n]) @ U
    return U


def pauli_y_encode_batch(n, inputs_batch):
    """PauliEncoding(pauli='Y') applied to |0...0>, vectorized over the batch.

    E @ |0..0> is the first column of kron_k RY(theta_k), i.e.
    kron_k [cos(theta_k/2), sin(theta_k/2)]  (qubit 0 most significant).
    Returns (2^n, batch) float32 — the RY-encoded state is purely real.
    """
    B, L = inputs_batch.shape
    phi = jnp.ones((B, 1), dtype=jnp.float32)
    for k in range(n):
        t = inputs_batch[:, k % L] * 0.5
        col = jnp.stack([jnp.cos(t), jnp.sin(t)], axis=1)            # (B, 2)
        phi = (phi[:, :, None] * col[:, None, :]).reshape(B, -1)     # per-batch kron
    return phi.T                                                      # (N, B) float32


def zmeasure_diag(n):
    # PauliZ on qubit i, expanded; qubit 0 is the most-significant bit of the state index.
    idx = jnp.arange(2 ** n)
    rows = []
    for i in range(n):
        bit = (idx >> (n - 1 - i)) & 1
        rows.append(1.0 - 2.0 * bit.astype(jnp.float32))
    return jnp.stack(rows, axis=0)  # (n, 2^n)


# ----------------------------------------------------------------------------
# Pallas kernel: packed complex matmul U @ phi + Z-expectation (the hot path)
# ----------------------------------------------------------------------------
def qcir_kernel(u_ref, phi_ref, z4_ref, out_ref):
    # u_ref   : (2N, K) bf16  — K=N:  [ur; ui]           (real RY-encoded state)
    #                           K=2N: [[ur,-ui],[ui,ur]] (complex-state fallback)
    # phi_ref : (K, BT) bf16  — BT = 128 lane-dense batch tile
    # z4_ref  : (NQP, N) f32  — 4 * Z diagonals (rows >= nqubits are zero padding)
    # out_ref : (NQP, BT) f32
    po = jnp.dot(u_ref[...], phi_ref[...],
                 preferred_element_type=jnp.float32)   # (2N, BT) f32, single MXU push
    n = po.shape[0] // 2
    por = po[:n, :]
    poi = po[n:, :]
    prob = por * por + poi * poi                        # |phi_out|^2, (N, BT), VPU f32
    # 4*<phi|Z_q|phi>: tiny second MXU dot (4x scale pre-folded into z4).
    out_ref[...] = jnp.dot(z4_ref[...], prob, preferred_element_type=jnp.float32)


def qcir_forward(U, phi_nb, zdiag):
    """U: (N,N) complex64, phi_nb: (N,B) real f32 (or complex64), zdiag: (nq,N) f32 -> (B,nq) f32."""
    N = U.shape[0]
    B = phi_nb.shape[1]
    nq = zdiag.shape[0]

    LANE = 128
    Bp = pl.cdiv(B, LANE) * LANE                       # lane-dense batch, no forced 2-tile minimum
    NQP = pl.cdiv(nq, 8) * 8                           # full-sublane output rows

    ur = jnp.real(U).astype(jnp.float32)
    ui = jnp.imag(U).astype(jnp.float32)
    if jnp.iscomplexobj(phi_nb):
        # Fallback for a genuinely complex state: full packing, contraction K = 2N.
        u_packed = jnp.block([[ur, -ui], [ui, ur]])                            # (2N, 2N)
        phi_packed = jnp.concatenate(
            [jnp.real(phi_nb), jnp.imag(phi_nb)], axis=0).astype(jnp.float32)  # (2N, B)
    else:
        # RY-encoded state is purely real: drop the zero imaginary half, K = N.
        u_packed = jnp.concatenate([ur, ui], axis=0)                           # (2N, N)
        phi_packed = phi_nb.astype(jnp.float32)                                # (N, B)
    K = u_packed.shape[1]

    u_packed = u_packed.astype(jnp.bfloat16)
    phi_packed = jnp.pad(phi_packed, ((0, 0), (0, Bp - B))).astype(jnp.bfloat16)
    z4_pad = jnp.pad(4.0 * zdiag.astype(jnp.float32), ((0, NQP - nq), (0, 0)))  # (NQP, N)

    out = pl.pallas_call(
        qcir_kernel,
        out_shape=jax.ShapeDtypeStruct((NQP, Bp), jnp.float32),
        grid=(Bp // LANE,),
        in_specs=[
            pl.BlockSpec((2 * N, K), lambda i: (0, 0)),     # U packed, grid-invariant
            pl.BlockSpec((K, LANE), lambda i: (0, i)),      # phi batch tile
            pl.BlockSpec((NQP, N), lambda i: (0, 0)),       # 4*Z diagonals, grid-invariant
        ],
        out_specs=pl.BlockSpec((NQP, LANE), lambda i: (0, i)),
        compiler_params=pltpu.CompilerParams(
            dimension_semantics=("parallel",)),
    )(u_packed, phi_packed, z4_pad)

    return out[:nq, :B].T  # (B, nq)


# ----------------------------------------------------------------------------
# References
# ----------------------------------------------------------------------------
_HI = jax.lax.Precision.HIGHEST


def reference_forward(U, phi_nb, zdiag):
    phi_out = jnp.dot(U, phi_nb.astype(U.dtype), precision=_HI)       # (N, B)
    prob = jnp.real(phi_out * jnp.conj(phi_out)).astype(jnp.float32)
    return (4.0 * jnp.dot(zdiag, prob, precision=_HI)).T              # (B, nq)


def reference_forward_bf16_inputs(U, phi_nb, zdiag):
    # Same bf16 rounding of the MXU inputs as the kernel, math in f32: isolates
    # the kernel arithmetic from the (expected) bf16 quantization error.
    rnd = lambda x: x.astype(jnp.bfloat16).astype(jnp.float32)
    ur, ui = rnd(jnp.real(U)), rnd(jnp.imag(U))
    if jnp.iscomplexobj(phi_nb):
        pr, pi = rnd(jnp.real(phi_nb)), rnd(jnp.imag(phi_nb))
    else:
        pr = rnd(phi_nb)
        pi = jnp.zeros_like(pr)
    por = jnp.dot(ur, pr, precision=_HI) - jnp.dot(ui, pi, precision=_HI)
    poi = jnp.dot(ur, pi, precision=_HI) + jnp.dot(ui, pr, precision=_HI)
    prob = por * por + poi * poi
    return jnp.dot(4.0 * zdiag, prob, precision=_HI).T


# ----------------------------------------------------------------------------
if __name__ == "__main__":
    nqubits = 4
    batch = 8
    N = 2 ** nqubits

    key = jax.random.PRNGKey(0)
    k_w, k_x = jax.random.split(key)
    # nn.init.uniform_(torch.empty(18*nqubits), a=0, b=2*pi) — deterministic synthetic init
    weight = jax.random.uniform(k_w, (18 * nqubits,), minval=0.0,
                                maxval=2.0 * math.pi, dtype=jnp.float32)
    # input_lst_batch: batch of angle lists, one angle per qubit
    input_lst_batch = jax.random.uniform(k_x, (batch, nqubits), minval=0.0,
                                         maxval=2.0 * math.pi, dtype=jnp.float32)

    # build_circuit(): encoded states (2^n, batch) and full circuit unitary (2^n, 2^n)
    phi_encoded = pauli_y_encode_batch(nqubits, input_lst_batch)   # (N, B) real f32
    U = build_unitary(nqubits, weight)                             # (N, N) complex64
    zdiag = zmeasure_diag(nqubits)                                 # (nq, N)

    rst = qcir_forward(U, phi_encoded, zdiag)
    rst = jax.block_until_ready(rst)

    assert rst.shape == (batch, nqubits) and rst.dtype == jnp.float32

    # Kernel arithmetic check (identical bf16-rounded inputs, f32 math).
    ref_q = reference_forward_bf16_inputs(U, phi_encoded, zdiag)
    assert jnp.allclose(rst, ref_q, atol=1e-2), (rst, ref_q)

    # Full-precision semantic check; tolerance widened for the bf16 MXU inputs.
    ref = reference_forward(U, phi_encoded, zdiag)
    assert jnp.allclose(rst, ref, atol=4e-2), (rst, ref)

    print("KERNEL_OK")
</pallas_src>

<mosaic_0001>
module attributes {stable_mosaic.version = 11 : i64} {
  func.func @qcir_kernel(%arg0: i32, %arg1: memref<32x16xbf16, #tpu.memory_space<vmem>>, %arg2: memref<16x128xbf16, #tpu.memory_space<vmem>>, %arg3: memref<8x16xf32, #tpu.memory_space<vmem>>, %arg4: memref<8x128xf32, #tpu.memory_space<vmem>>) attributes {dimension_semantics = [#tpu.dimension_semantics<parallel>], iteration_bounds = array<i64: 1>, scalar_prefetch = 0 : i64, scratch_operands = 0 : i64, tpu.core_type = #tpu.core_type<tc>, window_params = [{pipeline_mode = #tpu.pipeline_mode<synchronous>, transform_indices = @transform_0, window_bounds = array<i64: 32, 16>}, {transform_indices = @transform_1, window_bounds = array<i64: 16, 128>}, {pipeline_mode = #tpu.pipeline_mode<synchronous>, transform_indices = @transform_2, window_bounds = array<i64: 8, 16>}, {transform_indices = @transform_3, window_bounds = array<i64: 8, 128>}]} {
    %c0 = arith.constant 0 : index
    %c0_0 = arith.constant 0 : index
    %0 = vector.load %arg1[%c0, %c0_0] : memref<32x16xbf16, #tpu.memory_space<vmem>>, vector<32x16xbf16>
    %c0_1 = arith.constant 0 : index
    %c0_2 = arith.constant 0 : index
    %1 = vector.load %arg2[%c0_1, %c0_2] : memref<16x128xbf16, #tpu.memory_space<vmem>>, vector<16x128xbf16>
    %cst = arith.constant dense<0.000000e+00> : vector<32x128xf32>
    %2 = tpu.matmul %0, %1, %cst {dimension_numbers = #tpu.dot_dimension_numbers<[1], [0], [0], [1], [0, 0, 1, 1], [], []>} : vector<32x16xbf16>, vector<16x128xbf16>, vector<32x128xf32> -> vector<32x128xf32>
    %3 = vector.extract_strided_slice %2 {offsets = [0, 0], sizes = [16, 128], strides = [1, 1]} : vector<32x128xf32> to vector<16x128xf32>
    %4 = vector.extract_strided_slice %2 {offsets = [16, 0], sizes = [16, 128], strides = [1, 1]} : vector<32x128xf32> to vector<16x128xf32>
    %5 = arith.mulf %3, %3 : vector<16x128xf32>
    %6 = arith.mulf %4, %4 : vector<16x128xf32>
    %7 = arith.addf %5, %6 : vector<16x128xf32>
    %c0_3 = arith.constant 0 : index
    %c0_4 = arith.constant 0 : index
    %8 = vector.load %arg3[%c0_3, %c0_4] : memref<8x16xf32, #tpu.memory_space<vmem>>, vector<8x16xf32>
    %cst_5 = arith.constant dense<0.000000e+00> : vector<8x128xf32>
    %9 = tpu.matmul %8, %7, %cst_5 {dimension_numbers = #tpu.dot_dimension_numbers<[1], [0], [0], [1], [0, 0, 1, 1], [], []>} : vector<8x16xf32>, vector<16x128xf32>, vector<8x128xf32> -> vector<8x128xf32>
    %c0_6 = arith.constant 0 : index
    %c0_7 = arith.constant 0 : index
    %10 = vector.load %arg4[%c0_6, %c0_7] : memref<8x128xf32, #tpu.memory_space<vmem>>, vector<8x128xf32>
    tpu.vector_store %arg4[%c0_6, %c0_7], %9 {strides = array<i32>} : memref<8x128xf32, #tpu.memory_space<vmem>>, vector<8x128xf32>,
    return
  }
  func.func @transform_0(%arg0: i32) -> (i32, i32) {
    %c0_i32 = arith.constant 0 : i32
    %c0_i32_0 = arith.constant 0 : i32
    %c0_i32_1 = arith.constant 0 : i32
    return %c0_i32, %c0_i32_0 : i32, i32
  }
  func.func @transform_1(%arg0: i32) -> (i32, i32) {
    %c0_i32 = arith.constant 0 : i32
    %c0_i32_0 = arith.constant 0 : i32
    return %c0_i32, %arg0 : i32, i32
  }
  func.func @transform_2(%arg0: i32) -> (i32, i32) {
    %c0_i32 = arith.constant 0 : i32
    %c0_i32_0 = arith.constant 0 : i32
    %c0_i32_1 = arith.constant 0 : i32
    return %c0_i32, %c0_i32_0 : i32, i32
  }
  func.func @transform_3(%arg0: i32) -> (i32, i32) {
    %c0_i32 = arith.constant 0 : i32
    %c0_i32_0 = arith.constant 0 : i32
    return %c0_i32, %arg0 : i32, i32
  }
}

</mosaic_0001>

<bundles_post_ra>
// kernel: tpu_custom_call.1
= control target key start
LH: loop header
LB: loop body
LE: loop exit
PB: predicated region body
PF: predicated region fallthrough
CT: control target
= control target key end

     0   :  { %vm38_vm0 = vcmask 130048   ;;  %s299_s0 = inlined_call_operand.vmem [shape: bf16[32,16], index: 0, kind: input, shape index: {}]   ;;  %s300_s1 = inlined_call_operand.vmem [shape: bf16[16,128], index: 1, kind: input, shape index: {}]   ;;  %s301_s2 = inlined_call_operand.vmem [shape: f32[8,16], index: 2, kind: input, shape index: {}]   ;;  %s302_s3 = inlined_call_operand.hbm [shape: f32[8,128], index: 3, kind: output, shape index: {}]  }
   0x1   :  { %v221_v0 = vld [vmem:[%s300_s1] sm:$0xff]   ;;  %v223_v2 = vld [vmem:[%s299_s0 + $0x8] sm:$0xff]  }
   0x2   :  { %v222_v1 = vld [vmem:[%s299_s0] sm:$0xff]   ;;  %201 = vmatprep.subr.bf16.mxu0 %v221_v0 }
   0x3   :  { %202 = vmatpush3.bf16.msra.mxu0 %v221_v0  ;;  %203 = vmatprep.mubr.msk.bf16.mxu0 %vm38_vm0, %v222_v1 }
   0x4   :  { %8 = vsyncpa [#allocation3], 0  ;;  %v248_v3 = vmov 0.0|0.0   ;;  %vm249_vm1 = vmmov 0   ;;  %v250_v4 = vmov 0.0   ;;  %v100_v16 = vld [vmem:[%s301_s2] sm:$0xff] }
   0x5   :  { %214 = vmatprep.subr.bf16.mxu1 %v248_v3  ;;  %211 = vmatprep.mubr.msk.f32.mxu1 %vm249_vm1, %v250_v4  ;;  %s251_s18 = smov [#allocation2]  }
   0x6   :  { %204 = vmatmul.mubr.msk.bf16.vlgmr.msra.gmra.mrb[0].mxu0 %vm38_vm0, %v223_v2  ;;  %s181_s19 = sshll.u32 %s251_s18, 4  ;;  %s182_s19 = int_to_ptr.vmem [resolvable:$true] %s181_s19 }
   0x7   :  { %s224_s20 = scalar_lea.vmem %s182_s19, 128  ;;  %p229_p1 = scmp.lt.s32.totalorder %s182_s19, %s182_s19 }
   0x8   :  { %p225_p0 = scmp.ne.s32.totalorder %s182_s19, %s224_s20  ;;  %p230_p2 = scmp.lt.s32.totalorder %s224_s20, %s224_s20 }
   0xa   :  { %p231_p3 = por %p230_p2, %p229_p1 }
   0xc   :  { %p232_p4 = pnand %p231_p3, %p225_p0 }
  0xd9   :  { %v205_v5 = vpop.f32.mrb[0].mxu0 }
  0xda   :  { %v96_v6 = vmul.f32 %v205_v5, %v205_v5  ;;  %v79_v7 = vpop.f32.mrb[1].mxu0 }
  0xdb   :  { %v94_v8 = vmul.f32 %v79_v7, %v79_v7  ;;  %v206_v9 = vpop.f32.mrb[2].mxu0 }
  0xdc   :  { %v97_v10 = vmul.f32 %v206_v9, %v206_v9  ;;  %v82_v11 = vpop.f32.mrb[3].mxu0 }
  0xdd   :  { %v98_v12 = vadd.f32 %v96_v6, %v94_v8  ;;  %v95_v13 = vmul.f32 %v82_v11, %v82_v11 }
  0xdf   :  { %v99_v14 = vadd.f32 %v97_v10, %v95_v13 }
  0xe1   :  { %v215_v15 = vpack.c.bf16 %v99_v14, %v98_v12 }
  0xe3   :  { %216 = vmatpush3.bf16.msra.mxu1 %v215_v15 }
  0xe6   :  { %212 = vmatmul.mubr.msk.f32.vlgmr.msra.gmra.mrb[0].mxu1 %vm38_vm0, %v100_v16 }
 0x1b9   :  { %v170_v17 = vpop.f32.mrb[0].mxu1 }
 0x1ba   :  { %174 = vst [vmem:[#allocation2] sm:$0xff] %v170_v17  ;;  %v213_v18 = vpop.f32.mrb[1].mxu1 }
 0x1bb   :  { %235 = shalt.err (!%p232_p4)
}
 0x1bc   :  { %s236_s23 = scalar_lea.hbm %s302_s3, 128 }
 0x1bd   :  { %p237_p5 = scmp.ne.s32.totalorder %s302_s3, %s236_s23  ;;  %p240_p6 = scmp.lt.u32.totalorder %s236_s23, %s302_s3 }
 0x1bf   :  { %p242_p7 = pnand %p240_p6, %p237_p5 }
 0x1c1   :  { %245 = shalt.err (!%p242_p7)
}
 0x1c2   :  { %184 = dma.vmem_to_hbm [thread:$0]  %s182_s19, 128, %s302_s3, [#allocation3]  }
 0x1c3   :  { %246 = dma.done.wait [#allocation3], 128  }
 0x1c4   :  { %247 = vsyncadd [#allocation3], 4294967168 }
 0x1c5   :  { %188 = vsyncpa [#allocation3], 1 }

</bundles_post_ra>
